<compile_context>
chip_gen: v5e
topology: v5e:2x2
jax: 0.10.0
libtpu: 0.0.40
codegen_flags: <defaults>
</compile_context>

<pallas_src>
import math
import functools

import jax
import jax.numpy as jnp
from jax import lax
from jax.experimental import pallas as pl
from jax.experimental.pallas import tpu as pltpu


# ----------------------------------------------------------------------------
# Pass 1: fused Q/K/V projections.
# ----------------------------------------------------------------------------
def qkv_proj_kernel(xq_ref, xk_ref, xv_ref,
                    wq_ref, bq_ref, wk_ref, bk_ref, wv_ref, bv_ref,
                    q_out_ref, k_out_ref, v_out_ref):
    # x blocks: (1, TM, H).  Weights (H, H) bf16 / biases (1, H) f32 are whole
    # arrays resident in VMEM (single copy, no per-step double buffering).
    xq = xq_ref[0].astype(jnp.bfloat16)
    xk = xk_ref[0].astype(jnp.bfloat16)
    xv = xv_ref[0].astype(jnp.bfloat16)
    q_out_ref[0] = (jnp.dot(xq, wq_ref[...], preferred_element_type=jnp.float32)
                    + bq_ref[...]).astype(q_out_ref.dtype)
    k_out_ref[0] = (jnp.dot(xk, wk_ref[...], preferred_element_type=jnp.float32)
                    + bk_ref[...]).astype(k_out_ref.dtype)
    v_out_ref[0] = (jnp.dot(xv, wv_ref[...], preferred_element_type=jnp.float32)
                    + bv_ref[...]).astype(v_out_ref.dtype)


# ----------------------------------------------------------------------------
# Pass 2: flash attention (online softmax over KV tiles) + output projection.
# ----------------------------------------------------------------------------
def flash_attn_out_kernel(q_ref, k_ref, v_ref, wot_ref, bo_ref, out_ref,
                          m_sc, l_sc, acc_sc, *, num_heads):
    # q_ref: (1, TQ, H) bf16, already projected and pre-scaled by 1/sqrt(dh).
    # k_ref / v_ref: (1, TK, H) bf16.  out_ref: (1, H, TQ).
    ki = pl.program_id(2)
    nk = pl.num_programs(2)
    H = q_ref.shape[2]
    dh = H // num_heads

    @pl.when(ki == 0)
    def _():
        m_sc[...] = jnp.full(m_sc.shape, -jnp.inf, dtype=m_sc.dtype)
        l_sc[...] = jnp.zeros(l_sc.shape, dtype=l_sc.dtype)
        acc_sc[...] = jnp.zeros(acc_sc.shape, dtype=acc_sc.dtype)

    Q = q_ref[0]            # (TQ, H) bf16
    K = k_ref[0]            # (TK, H) bf16
    V = v_ref[0]            # (TK, H) bf16

    for h in range(num_heads):
        sl = slice(h * dh, (h + 1) * dh)
        qh = Q[:, sl]
        kh = K[:, sl]
        vh = V[:, sl]

        # scores = qh @ kh^T (no transpose materialized; scale already folded
        # into the Q projection).
        s = lax.dot_general(qh, kh, (((1,), (1,)), ((), ())),
                            preferred_element_type=jnp.float32)      # (TQ, TK)

        m_prev = m_sc[:, h:h + 1]                                    # (TQ, 1)
        m_new = jnp.maximum(m_prev, jnp.max(s, axis=-1, keepdims=True))
        alpha = jnp.exp(m_prev - m_new)                              # (TQ, 1)
        e = jnp.exp(s - m_new)                                       # (TQ, TK)

        l_sc[:, h:h + 1] = alpha * l_sc[:, h:h + 1] + jnp.sum(e, axis=-1,
                                                              keepdims=True)
        m_sc[:, h:h + 1] = m_new

        # Deferred normalization: accumulate the UNnormalized context in f32.
        ctx_h = jnp.dot(e.astype(jnp.bfloat16), vh,
                        preferred_element_type=jnp.float32)          # (TQ, dh)
        acc_sc[:, sl] = alpha * acc_sc[:, sl] + ctx_h

    @pl.when(ki == nk - 1)
    def _():
        # Normalize each head's context by its softmax denominator (EUP recip).
        for h in range(num_heads):
            sl = slice(h * dh, (h + 1) * dh)
            inv_h = pl.reciprocal(l_sc[:, h:h + 1], approx=True)     # (TQ, 1)
            acc_sc[:, sl] = acc_sc[:, sl] * inv_h
        ctx = acc_sc[...].astype(jnp.bfloat16)                       # (TQ, H)
        # Single K=H output projection, fused head-concat, producing the
        # transposed (H, TQ) tile directly:
        #   out[i, j] = sum_c W_out[c, i] * ctx[j, c] + b_out[i]
        out_t = lax.dot_general(wot_ref[...], ctx, (((1,), (1,)), ((), ())),
                                preferred_element_type=jnp.float32)  # (H, TQ)
        out_ref[0] = (out_t + bo_ref[...]).astype(out_ref.dtype)


# ----------------------------------------------------------------------------
# Wrapper.
# ----------------------------------------------------------------------------
def _pick_tile(dim, candidates):
    for c in candidates:
        if c <= dim and dim % c == 0:
            return c
    return dim


def _vmem_limit_bytes():
    # Generation-aware budget: ~80% of physical VMEM (v5e/v6e: ~102 MiB,
    # v7x: ~51 MiB), leaving headroom for Mosaic internal scratch.
    try:
        return int(pltpu.get_tpu_info().vmem_capacity_bytes * 0.8)
    except Exception:
        return None   # unknown chip -> compiler default


def multi_head_attention(query, key, value, params, num_heads,
                         *, tq=None, tk=None, tm=None):
    """query/key/value: (B, S, H).  Returns (B, H, S) like the PyTorch module.

    params = (wq, bq, wk, bk, wv, bv, wo, bo); weights stored as (in, out)
    (the transpose of nn.Linear.weight), biases as (1, out).
    Inputs may be f32 or bf16 (bf16 avoids the in-kernel cast and halves DMA).
    """
    # TODO(synk): optional attention `mask` of the PyTorch forward not implemented.
    B, S, H = query.shape
    assert H % num_heads == 0, "hidden_size must be divisible by num_heads"
    dh = H // num_heads
    wq, bq, wk, bk, wv, bv, wo, bo = params

    # Fold the 1/sqrt(dh) attention scale into the Q projection (free).
    scale = 1.0 / math.sqrt(dh)
    wq_b = (wq * scale).astype(jnp.bfloat16)
    bq_s = bq * scale
    wk_b = wk.astype(jnp.bfloat16)
    wv_b = wv.astype(jnp.bfloat16)
    # Output weight pre-transposed (out, in) so the fused output projection is
    # a contract-last-dims MXU matmul producing the (H, TQ) tile directly.
    wot_b = wo.T.astype(jnp.bfloat16)
    bo_t = bo.T                                      # (H, 1)

    vmem_limit = _vmem_limit_bytes()
    # Single resident copy for constant weights/biases (no double-buffering).
    wspec = pl.BlockSpec(memory_space=pltpu.MemorySpace.VMEM)

    # ------------------- pass 1: Q/K/V projections --------------------------
    if tm is None:
        tm = _pick_tile(S, (512, 256, 128, 64, 32, 16, 8))
    x_spec = pl.BlockSpec((1, tm, H), lambda b, i: (b, i, 0))
    proj_shape = jax.ShapeDtypeStruct((B, S, H), jnp.bfloat16)

    qp, kp, vp = pl.pallas_call(
        qkv_proj_kernel,
        out_shape=(proj_shape, proj_shape, proj_shape),
        grid_spec=pltpu.PrefetchScalarGridSpec(
            num_scalar_prefetch=0,
            grid=(B, S // tm),
            in_specs=[x_spec, x_spec, x_spec,
                      wspec, wspec, wspec, wspec, wspec, wspec],
            out_specs=[x_spec, x_spec, x_spec],
        ),
        compiler_params=pltpu.CompilerParams(
            dimension_semantics=("parallel", "parallel"),
            vmem_limit_bytes=vmem_limit),
        cost_estimate=pl.CostEstimate(
            flops=6 * B * S * H * H,
            transcendentals=0,
            bytes_accessed=(3 * B * S * H * (query.dtype.itemsize + 2)
                            + 3 * H * H * 2 + 3 * H * 4)),
    )(query, key, value, wq_b, bq_s, wk_b, bk, wv_b, bv)

    # ------------- pass 2: flash attention + output projection --------------
    if tq is None:
        tq = _pick_tile(S, (256, 128))
    if tk is None:
        tk = _pick_tile(S, (512, 256, 128))
    assert S % tq == 0 and S % tk == 0
    assert tq == S or tq % 128 == 0, "query tile must keep the output lane-dense"

    q_spec = pl.BlockSpec((1, tq, H), lambda b, qi, ki: (b, qi, 0))
    kv_spec = pl.BlockSpec((1, tk, H), lambda b, qi, ki: (b, ki, 0))
    out_spec = pl.BlockSpec((1, H, tq), lambda b, qi, ki: (b, 0, qi))

    flops = B * (4 * S * S * H + 2 * S * H * H)
    transcendentals = B * num_heads * S * S
    bytes_accessed = (3 * B * S * H * 2 + B * H * S * query.dtype.itemsize
                      + H * H * 2 + H * 4)

    out = pl.pallas_call(
        functools.partial(flash_attn_out_kernel, num_heads=num_heads),
        out_shape=jax.ShapeDtypeStruct((B, H, S), query.dtype),
        grid_spec=pltpu.PrefetchScalarGridSpec(
            num_scalar_prefetch=0,
            grid=(B, S // tq, S // tk),
            in_specs=[q_spec, kv_spec, kv_spec, wspec, wspec],
            out_specs=out_spec,
            scratch_shapes=[
                pltpu.VMEM((tq, num_heads), jnp.float32),   # running max m
                pltpu.VMEM((tq, num_heads), jnp.float32),   # running denom l
                pltpu.VMEM((tq, H), jnp.float32),           # unnormalized ctx
            ],
        ),
        compiler_params=pltpu.CompilerParams(
            dimension_semantics=("parallel", "parallel", "arbitrary"),
            vmem_limit_bytes=vmem_limit),
        cost_estimate=pl.CostEstimate(
            flops=flops,
            transcendentals=transcendentals,
            bytes_accessed=bytes_accessed),
    )(qp, kp, vp, wot_b, bo_t)

    return out


def reference_mha(query, key, value, params, num_heads):
    """Pure-JAX f32 reference mirroring the PyTorch forward (mask=None)."""
    B, S, H = query.shape
    dh = H // num_heads
    wq, bq, wk, bk, wv, bv, wo, bo = params
    Q = query @ wq + bq[0]
    K = key @ wk + bk[0]
    V = value @ wv + bv[0]
    Qh = Q.reshape(B, S, num_heads, dh).transpose(0, 2, 1, 3)
    Kh = K.reshape(B, S, num_heads, dh).transpose(0, 2, 1, 3)
    Vh = V.reshape(B, S, num_heads, dh).transpose(0, 2, 1, 3)
    att = jnp.einsum('bhqd,bhkd->bhqk', Qh, Kh) / math.sqrt(dh)
    w = jax.nn.softmax(att, axis=-1)
    x = jnp.einsum('bhqk,bhkd->bhqd', w, Vh)
    x = x.transpose(0, 2, 1, 3).reshape(B, S, H)
    x = x @ wo + bo[0]
    return jnp.transpose(x, (0, 2, 1))


if __name__ == "__main__":
    B, S, H, NH = 2, 256, 32, 4

    key0 = jax.random.PRNGKey(0)
    ks = jax.random.split(key0, 11)

    bound = 1.0 / math.sqrt(H)
    wq = jax.random.uniform(ks[0], (H, H), jnp.float32, -bound, bound)
    bq = jax.random.uniform(ks[1], (1, H), jnp.float32, -bound, bound)
    wk = jax.random.uniform(ks[2], (H, H), jnp.float32, -bound, bound)
    bk = jax.random.uniform(ks[3], (1, H), jnp.float32, -bound, bound)
    wv = jax.random.uniform(ks[4], (H, H), jnp.float32, -bound, bound)
    bv = jax.random.uniform(ks[5], (1, H), jnp.float32, -bound, bound)
    wo = jax.random.uniform(ks[6], (H, H), jnp.float32, -bound, bound)
    bo = jax.random.uniform(ks[7], (1, H), jnp.float32, -bound, bound)
    params = (wq, bq, wk, bk, wv, bv, wo, bo)

    query = jax.random.normal(ks[8], (B, S, H), jnp.float32)
    key_in = jax.random.normal(ks[9], (B, S, H), jnp.float32)
    value = jax.random.normal(ks[10], (B, S, H), jnp.float32)

    # Main check: exercises query tiling (NQ=2) AND online-softmax over KV (NK=2).
    out = multi_head_attention(query, key_in, value, params, NH,
                               tq=128, tk=128, tm=64)
    out = jax.block_until_ready(out)
    ref = reference_mha(query, key_in, value, params, NH)
    assert out.shape == (B, H, S), out.shape
    # bf16 MXU operands + bf16 projected activations + approx reciprocal.
    assert jnp.allclose(out, ref, atol=3e-2, rtol=3e-2), "mismatch vs reference"

    # Tiny-sequence fallback path (TQ == TK == S, single KV step).
    S2 = 8
    q2 = jax.random.normal(jax.random.PRNGKey(1), (B, S2, H), jnp.float32)
    k2 = jax.random.normal(jax.random.PRNGKey(2), (B, S2, H), jnp.float32)
    v2 = jax.random.normal(jax.random.PRNGKey(3), (B, S2, H), jnp.float32)
    out2 = jax.block_until_ready(multi_head_attention(q2, k2, v2, params, NH))
    ref2 = reference_mha(q2, k2, v2, params, NH)
    assert out2.shape == (B, H, S2), out2.shape
    assert jnp.allclose(out2, ref2, atol=3e-2, rtol=3e-2), "mismatch (small S)"

    print("KERNEL_OK")
</pallas_src>

<mosaic_0001>
module attributes {stable_mosaic.version = 11 : i64} {
  func.func @qkv_proj_kernel(%arg0: i32, %arg1: i32, %arg2: memref<1x64x32xf32, #tpu.memory_space<vmem>>, %arg3: memref<1x64x32xf32, #tpu.memory_space<vmem>>, %arg4: memref<1x64x32xf32, #tpu.memory_space<vmem>>, %arg5: memref<32x32xbf16, #tpu.memory_space<vmem>>, %arg6: memref<1x32xf32, #tpu.memory_space<vmem>>, %arg7: memref<32x32xbf16, #tpu.memory_space<vmem>>, %arg8: memref<1x32xf32, #tpu.memory_space<vmem>>, %arg9: memref<32x32xbf16, #tpu.memory_space<vmem>>, %arg10: memref<1x32xf32, #tpu.memory_space<vmem>>, %arg11: memref<1x64x32xbf16, #tpu.memory_space<vmem>>, %arg12: memref<1x64x32xbf16, #tpu.memory_space<vmem>>, %arg13: memref<1x64x32xbf16, #tpu.memory_space<vmem>>) attributes {dimension_semantics = [#tpu.dimension_semantics<parallel>, #tpu.dimension_semantics<parallel>], iteration_bounds = array<i64: 2, 4>, scalar_prefetch = 0 : i64, scratch_operands = 0 : i64, tpu.core_type = #tpu.core_type<tc>, window_params = [{transform_indices = @transform_0, window_bounds = array<i64: 1, 64, 32>}, {transform_indices = @transform_1, window_bounds = array<i64: 1, 64, 32>}, {transform_indices = @transform_2, window_bounds = array<i64: 1, 64, 32>}, {pipeline_mode = #tpu.pipeline_mode<synchronous>, transform_indices = @transform_3, window_bounds = array<i64: 32, 32>}, {pipeline_mode = #tpu.pipeline_mode<synchronous>, transform_indices = @transform_4, window_bounds = array<i64: 1, 32>}, {pipeline_mode = #tpu.pipeline_mode<synchronous>, transform_indices = @transform_5, window_bounds = array<i64: 32, 32>}, {pipeline_mode = #tpu.pipeline_mode<synchronous>, transform_indices = @transform_6, window_bounds = array<i64: 1, 32>}, {pipeline_mode = #tpu.pipeline_mode<synchronous>, transform_indices = @transform_7, window_bounds = array<i64: 32, 32>}, {pipeline_mode = #tpu.pipeline_mode<synchronous>, transform_indices = @transform_8, window_bounds = array<i64: 1, 32>}, {transform_indices = @transform_9, window_bounds = array<i64: 1, 64, 32>}, {transform_indices = @transform_10, window_bounds = array<i64: 1, 64, 32>}, {transform_indices = @transform_11, window_bounds = array<i64: 1, 64, 32>}]} {
    %c0 = arith.constant 0 : index
    %c0_0 = arith.constant 0 : index
    %c0_1 = arith.constant 0 : index
    %0 = vector.load %arg2[%c0, %c0_0, %c0_1] : memref<1x64x32xf32, #tpu.memory_space<vmem>>, vector<1x64x32xf32>
    %1 = vector.shape_cast %0 : vector<1x64x32xf32> to vector<64x32xf32>
    %2 = arith.truncf %1 : vector<64x32xf32> to vector<64x32xbf16>
    %c0_2 = arith.constant 0 : index
    %c0_3 = arith.constant 0 : index
    %c0_4 = arith.constant 0 : index
    %3 = vector.load %arg3[%c0_2, %c0_3, %c0_4] : memref<1x64x32xf32, #tpu.memory_space<vmem>>, vector<1x64x32xf32>
    %4 = vector.shape_cast %3 : vector<1x64x32xf32> to vector<64x32xf32>
    %5 = arith.truncf %4 : vector<64x32xf32> to vector<64x32xbf16>
    %c0_5 = arith.constant 0 : index
    %c0_6 = arith.constant 0 : index
    %c0_7 = arith.constant 0 : index
    %6 = vector.load %arg4[%c0_5, %c0_6, %c0_7] : memref<1x64x32xf32, #tpu.memory_space<vmem>>, vector<1x64x32xf32>
    %7 = vector.shape_cast %6 : vector<1x64x32xf32> to vector<64x32xf32>
    %8 = arith.truncf %7 : vector<64x32xf32> to vector<64x32xbf16>
    %c0_8 = arith.constant 0 : index
    %c0_9 = arith.constant 0 : index
    %9 = vector.load %arg5[%c0_8, %c0_9] : memref<32x32xbf16, #tpu.memory_space<vmem>>, vector<32x32xbf16>
    %cst = arith.constant dense<0.000000e+00> : vector<64x32xf32>
    %10 = tpu.matmul %2, %9, %cst {dimension_numbers = #tpu.dot_dimension_numbers<[1], [0], [0], [1], [0, 0, 1, 1], [], []>} : vector<64x32xbf16>, vector<32x32xbf16>, vector<64x32xf32> -> vector<64x32xf32>
    %c0_10 = arith.constant 0 : index
    %c0_11 = arith.constant 0 : index
    %11 = vector.load %arg6[%c0_10, %c0_11] : memref<1x32xf32, #tpu.memory_space<vmem>>, vector<1x32xf32>
    %12 = vector.broadcast %11 : vector<1x32xf32> to vector<64x32xf32>
    %13 = arith.addf %10, %12 : vector<64x32xf32>
    %14 = arith.truncf %13 : vector<64x32xf32> to vector<64x32xbf16>
    %c0_12 = arith.constant 0 : index
    %c0_13 = arith.constant 0 : index
    %c0_14 = arith.constant 0 : index
    %15 = vector.load %arg11[%c0_12, %c0_13, %c0_14] : memref<1x64x32xbf16, #tpu.memory_space<vmem>>, vector<1x64x32xbf16>
    %16 = vector.shape_cast %15 : vector<1x64x32xbf16> to vector<64x32xbf16>
    %17 = vector.shape_cast %14 : vector<64x32xbf16> to vector<1x64x32xbf16>
    tpu.vector_store %arg11[%c0_12, %c0_13, %c0_14], %17 {strides = array<i32>} : memref<1x64x32xbf16, #tpu.memory_space<vmem>>, vector<1x64x32xbf16>,
    %c0_15 = arith.constant 0 : index
    %c0_16 = arith.constant 0 : index
    %18 = vector.load %arg7[%c0_15, %c0_16] : memref<32x32xbf16, #tpu.memory_space<vmem>>, vector<32x32xbf16>
    %cst_17 = arith.constant dense<0.000000e+00> : vector<64x32xf32>
    %19 = tpu.matmul %5, %18, %cst_17 {dimension_numbers = #tpu.dot_dimension_numbers<[1], [0], [0], [1], [0, 0, 1, 1], [], []>} : vector<64x32xbf16>, vector<32x32xbf16>, vector<64x32xf32> -> vector<64x32xf32>
    %c0_18 = arith.constant 0 : index
    %c0_19 = arith.constant 0 : index
    %20 = vector.load %arg8[%c0_18, %c0_19] : memref<1x32xf32, #tpu.memory_space<vmem>>, vector<1x32xf32>
    %21 = vector.broadcast %20 : vector<1x32xf32> to vector<64x32xf32>
    %22 = arith.addf %19, %21 : vector<64x32xf32>
    %23 = arith.truncf %22 : vector<64x32xf32> to vector<64x32xbf16>
    %c0_20 = arith.constant 0 : index
    %c0_21 = arith.constant 0 : index
    %c0_22 = arith.constant 0 : index
    %24 = vector.load %arg12[%c0_20, %c0_21, %c0_22] : memref<1x64x32xbf16, #tpu.memory_space<vmem>>, vector<1x64x32xbf16>
    %25 = vector.shape_cast %24 : vector<1x64x32xbf16> to vector<64x32xbf16>
    %26 = vector.shape_cast %23 : vector<64x32xbf16> to vector<1x64x32xbf16>
    tpu.vector_store %arg12[%c0_20, %c0_21, %c0_22], %26 {strides = array<i32>} : memref<1x64x32xbf16, #tpu.memory_space<vmem>>, vector<1x64x32xbf16>,
    %c0_23 = arith.constant 0 : index
    %c0_24 = arith.constant 0 : index
    %27 = vector.load %arg9[%c0_23, %c0_24] : memref<32x32xbf16, #tpu.memory_space<vmem>>, vector<32x32xbf16>
    %cst_25 = arith.constant dense<0.000000e+00> : vector<64x32xf32>
    %28 = tpu.matmul %8, %27, %cst_25 {dimension_numbers = #tpu.dot_dimension_numbers<[1], [0], [0], [1], [0, 0, 1, 1], [], []>} : vector<64x32xbf16>, vector<32x32xbf16>, vector<64x32xf32> -> vector<64x32xf32>
    %c0_26 = arith.constant 0 : index
    %c0_27 = arith.constant 0 : index
    %29 = vector.load %arg10[%c0_26, %c0_27] : memref<1x32xf32, #tpu.memory_space<vmem>>, vector<1x32xf32>
    %30 = vector.broadcast %29 : vector<1x32xf32> to vector<64x32xf32>
    %31 = arith.addf %28, %30 : vector<64x32xf32>
    %32 = arith.truncf %31 : vector<64x32xf32> to vector<64x32xbf16>
    %c0_28 = arith.constant 0 : index
    %c0_29 = arith.constant 0 : index
    %c0_30 = arith.constant 0 : index
    %33 = vector.load %arg13[%c0_28, %c0_29, %c0_30] : memref<1x64x32xbf16, #tpu.memory_space<vmem>>, vector<1x64x32xbf16>
    %34 = vector.shape_cast %33 : vector<1x64x32xbf16> to vector<64x32xbf16>
    %35 = vector.shape_cast %32 : vector<64x32xbf16> to vector<1x64x32xbf16>
    tpu.vector_store %arg13[%c0_28, %c0_29, %c0_30], %35 {strides = array<i32>} : memref<1x64x32xbf16, #tpu.memory_space<vmem>>, vector<1x64x32xbf16>,
    return
  }
  func.func @transform_0(%arg0: i32, %arg1: i32) -> (i32, i32, i32) {
    %c0_i32 = arith.constant 0 : i32
    %c0_i32_0 = arith.constant 0 : i32
    return %arg0, %arg1, %c0_i32 : i32, i32, i32
  }
  func.func @transform_1(%arg0: i32, %arg1: i32) -> (i32, i32, i32) {
    %c0_i32 = arith.constant 0 : i32
    %c0_i32_0 = arith.constant 0 : i32
    return %arg0, %arg1, %c0_i32 : i32, i32, i32
  }
  func.func @transform_2(%arg0: i32, %arg1: i32) -> (i32, i32, i32) {
    %c0_i32 = arith.constant 0 : i32
    %c0_i32_0 = arith.constant 0 : i32
    return %arg0, %arg1, %c0_i32 : i32, i32, i32
  }
  func.func @transform_3(%arg0: i32, %arg1: i32) -> (i32, i32) {
    %c0_i32 = arith.constant 0 : i32
    %c0_i32_0 = arith.constant 0 : i32
    %c0_i32_1 = arith.constant 0 : i32
    return %c0_i32, %c0_i32_0 : i32, i32
  }
  func.func @transform_4(%arg0: i32, %arg1: i32) -> (i32, i32) {
    %c0_i32 = arith.constant 0 : i32
    %c0_i32_0 = arith.constant 0 : i32
    %c0_i32_1 = arith.constant 0 : i32
    return %c0_i32, %c0_i32_0 : i32, i32
  }
  func.func @transform_5(%arg0: i32, %arg1: i32) -> (i32, i32) {
    %c0_i32 = arith.constant 0 : i32
    %c0_i32_0 = arith.constant 0 : i32
    %c0_i32_1 = arith.constant 0 : i32
    return %c0_i32, %c0_i32_0 : i32, i32
  }
  func.func @transform_6(%arg0: i32, %arg1: i32) -> (i32, i32) {
    %c0_i32 = arith.constant 0 : i32
    %c0_i32_0 = arith.constant 0 : i32
    %c0_i32_1 = arith.constant 0 : i32
    return %c0_i32, %c0_i32_0 : i32, i32
  }
  func.func @transform_7(%arg0: i32, %arg1: i32) -> (i32, i32) {
    %c0_i32 = arith.constant 0 : i32
    %c0_i32_0 = arith.constant 0 : i32
    %c0_i32_1 = arith.constant 0 : i32
    return %c0_i32, %c0_i32_0 : i32, i32
  }
  func.func @transform_8(%arg0: i32, %arg1: i32) -> (i32, i32) {
    %c0_i32 = arith.constant 0 : i32
    %c0_i32_0 = arith.constant 0 : i32
    %c0_i32_1 = arith.constant 0 : i32
    return %c0_i32, %c0_i32_0 : i32, i32
  }
  func.func @transform_9(%arg0: i32, %arg1: i32) -> (i32, i32, i32) {
    %c0_i32 = arith.constant 0 : i32
    %c0_i32_0 = arith.constant 0 : i32
    return %arg0, %arg1, %c0_i32 : i32, i32, i32
  }
  func.func @transform_10(%arg0: i32, %arg1: i32) -> (i32, i32, i32) {
    %c0_i32 = arith.constant 0 : i32
    %c0_i32_0 = arith.constant 0 : i32
    return %arg0, %arg1, %c0_i32 : i32, i32, i32
  }
  func.func @transform_11(%arg0: i32, %arg1: i32) -> (i32, i32, i32) {
    %c0_i32 = arith.constant 0 : i32
    %c0_i32_0 = arith.constant 0 : i32
    return %arg0, %arg1, %c0_i32 : i32, i32, i32
  }
}

</mosaic_0001>

<bundles_post_ra>
// kernel: tpu_custom_call.1
= control target key start
LH: loop header
LB: loop body
LE: loop exit
PB: predicated region body
PF: predicated region fallthrough
CT: control target
= control target key end

     0   :  { %s1257_s17 = smov 0   ;;  %s1259_s18 = smov 0   ;;  %s1480_s0 = inlined_call_operand.vmem [shape: f32[2,256,32], index: 0, kind: input, shape index: {}]   ;;  %s1481_s1 = inlined_call_operand.vmem [shape: f32[2,256,32], index: 1, kind: input, shape index: {}]   ;;  %s1482_s2 = inlined_call_operand.vmem [shape: f32[2,256,32], index: 2, kind: input, shape index: {}]   ;;  %s1483_s3 = inlined_call_operand.vmem [shape: bf16[32,32], index: 3, kind: input, shape index: {}]   ;;  %s1484_s4 = inlined_call_operand.vmem [shape: f32[1,32], index: 4, kind: input, shape index: {}]   ;;  %s1485_s5 = inlined_call_operand.vmem [shape: bf16[32,32], index: 5, kind: input, shape index: {}]   ;;  %s1486_s6 = inlined_call_operand.vmem [shape: f32[1,32], index: 6, kind: input, shape index: {}]   ;;  %s1487_s7 = inlined_call_operand.vmem [shape: bf16[32,32], index: 7, kind: input, shape index: {}]   ;;  %s1488_s8 = inlined_call_operand.vmem [shape: f32[1,32], index: 8, kind: input, shape index: {}]   ;;  %s1489_s9 = inlined_call_operand.vmem [shape: bf16[2,256,32], index: 9, kind: output, shape index: {0}]   ;;  %s1490_s10 = inlined_call_operand.vmem [shape: bf16[2,256,32], index: 10, kind: output, shape index: {1}]   ;;  %s1491_s11 = inlined_call_operand.vmem [shape: bf16[2,256,32], index: 11, kind: output, shape index: {2}]  }
   0x1   :  { %s1261_s19 = smov 0   ;;  %s1263_s20 = smov 0  }
   0x2   :  { %s1265_s21 = smov 0  }
   0x3 LB: > { %s31_s22 = sadd.s32 1, %s1187_s19  ;;  %s34_s23 = sadd.s32 1, %s1191_s20  ;;  %s1195_s21 = sphi %s1265_s21, %s22_s21   ;;  %s1191_s20 = sphi %s1263_s20, %s1495_s20   ;;  %s1187_s19 = sphi %s1261_s19, %s1494_s19   ;;  %s1183_s18 = sphi %s1259_s18, %s1493_s18   ;;  %s1179_s17 = sphi %s1257_s17, %s1492_s17  }
   0x4   : > { %p32_p0 = scmp.ge.s32.totalorder %s31_s22, 4  ;;  %p1045_p1 = scmp.ge.s32.totalorder %s1195_s21, 1 }
   0x5   : > { %p401_p2 = scmp.lt.s32.totalorder %s1195_s21, 9 }
   0x6   : > { %s1497_s22 = smov (%p32_p0, %s31_s22), 0  ;;  %s1499_s23 = smov (!%p32_p0, %s34_s23), %s1191_s20 }
   0x7   : > { %p402_p3 = pnand %p1045_p1, %p401_p2  ;;  %p36_p4 = scmp.ge.s32.totalorder %s1499_s23, 2 }
   0x8   : > { %s1046_s30 = sshll.u32 (!%p402_p3), %s1179_s17, 3  ;;  %p486_p5 = scmp.lt.s32.totalorder (!%p402_p3), %s1183_s18, 1 }
   0x9   : > { %s1501_s23 = smov (%p36_p4, %s1499_s23), 0  ;;  %405 = sbr.rel (%p402_p3) target bundleno = 202 (0xca), region = 56 }
   0xa   : > { %p488_p6 = scmp.lt.s32.totalorder (!%p402_p3), %s1046_s30, 31 }
   0xe   : > { %v1103_v0 = vld [vmem:[%s1483_s3 + $0x8] sm:$0xff]  ;;  %v1102_v3 = vld [vmem:[%s1483_s3] sm:$0xff]  ;;  %s1503_s18 = smov (!%p486_p5, %s1183_s18), 1  ;;  %s1505_s30 = smov (!%p488_p6, %s1046_s30), 31  ;;  %vm602_vm0 = vcmask 261120   ;;  %vm652_vm1 = vcmask 257024  }
   0xf   : > { %v1105_v1 = vld [vmem:[%s1485_s5 + $0x8] sm:$0xff]  ;;  %621 = vmatpush.bf16.msra.mxu0 %v1103_v0  ;;  %1108 = vmatpush.bf16.msra.mxu3 %v1103_v0  ;;  %v1104_v4 = vld [vmem:[%s1485_s5] sm:$0xff]  ;;  %s1047_s17 = sshll.u32 %s1503_s18, 5 }
  0x10   : > { %v1107_v2 = vld [vmem:[%s1487_s7 + $0x8] sm:$0xff]  ;;  %1110 = vmatpush.bf16.msra.mxu1 %v1105_v1  ;;  %v1106_v5 = vld [vmem:[%s1487_s7] sm:$0xff]  ;;  %s1308_s25 = sadd.s32 %s1047_s17, %s1505_s30 }
  0x11   : > { %1112 = vmatpush.bf16.msra.mxu2 %v1107_v2  ;;  %s1048_s26 = sshll.u32 %s1308_s25, 3  ;;  %v1365_v42 = vld [vmem:[%s1484_s4] ss:$0 sm:$0xff]  ;;  %s1057_s27 = sshll.u32 %s1308_s25, 2 }
  0x12   : > { %s1314_s29 = scalar_lea.vmem %s1480_s0, %s1048_s26  ;;  %s1319_s18 = scalar_lea.vmem %s1481_s1, %s1048_s26  ;;  %v1370_v43 = vld [vmem:[%s1486_s6] ss:$0 sm:$0xff] }
  0x13   : > { %622 = vmatpush.bf16.msra.mxu0 %v1102_v3  ;;  %1109 = vmatpush.bf16.msra.mxu3 %v1102_v3  ;;  %v546_v6 = vld [vmem:[%s1314_s29] sm:$0xff]  ;;  %v547_v7 = vld [vmem:[%s1314_s29 + $0x8] sm:$0xff]  ;;  %v548_v8 = vld [vmem:[%s1314_s29 + $0x10] sm:$0xff]  ;;  %s1327_s15 = scalar_lea.vmem %s1482_s2, %s1048_s26  ;;  %s1377_s12 = scalar_lea.vmem %s1489_s9, %s1057_s27 }
  0x14   : > { %1111 = vmatpush.bf16.msra.mxu1 %v1104_v4  ;;  %v554_v9 = vpack.c.bf16 %v547_v7, %v546_v6  ;;  %v549_v10 = vld [vmem:[%s1314_s29 + $0x18] sm:$0xff]  ;;  %v560_v11 = vld [vmem:[%s1319_s18 + $0x10] sm:$0xff]  ;;  %v550_v18 = vld [vmem:[%s1314_s29 + $0x20] sm:$0xff]  ;;  %s1383_s30 = scalar_lea.vmem %s1490_s10, %s1057_s27  ;;  %s1400_s24 = scalar_lea.vmem %s1491_s11, %s1057_s27 }
  0x15   : > { %1113 = vmatpush.bf16.msra.mxu2 %v1106_v5  ;;  %v561_v12 = vld [vmem:[%s1319_s18 + $0x18] sm:$0xff]  ;;  %v555_v13 = vpack.c.bf16 %v549_v10, %v548_v8  ;;  %v572_v15 = vld [vmem:[%s1327_s15 + $0x10] sm:$0xff]  ;;  %v558_v19 = vld [vmem:[%s1319_s18] sm:$0xff] }
  0x16   : > { %v567_v14 = vpack.c.bf16 %v561_v12, %v560_v11  ;;  %v573_v16 = vld [vmem:[%s1327_s15 + $0x18] sm:$0xff]  ;;  %1072 = vmatmul.msk.bf16.vlgmr.msra.gmra.mxu0 %vm602_vm0, %v554_v9  ;;  %v559_v20 = vld [vmem:[%s1319_s18 + $0x8] sm:$0xff]  ;;  %v562_v22 = vld [vmem:[%s1319_s18 + $0x20] sm:$0xff] }
  0x17   : > { %699 = vmatpush.bf16.msrb.mxu0 %v1105_v1  ;;  %v579_v17 = vpack.c.bf16 %v573_v16, %v572_v15  ;;  %1073 = vmatmul.msk.bf16.vlgmr.msra.gmra.mxu3 %vm602_vm0, %v555_v13  ;;  %v551_v21 = vld [vmem:[%s1314_s29 + $0x28] sm:$0xff]  ;;  %v574_v24 = vld [vmem:[%s1327_s15 + $0x20] sm:$0xff]  ;;  %v566_v26 = vpack.c.bf16 %v559_v20, %v558_v19  ;;  %v552_v30 = vld [vmem:[%s1314_s29 + $0x30] sm:$0xff] }
  0x18   : > { %1085 = vmatmul.msk.bf16.vlgmr.msra.gmra.mxu1 %vm602_vm0, %v567_v14  ;;  %v563_v23 = vld [vmem:[%s1319_s18 + $0x28] sm:$0xff]  ;;  %v556_v27 = vpack.c.bf16 %v551_v21, %v550_v18  ;;  %v570_v31 = vld [vmem:[%s1327_s15] sm:$0xff]  ;;  %v553_v33 = vld [vmem:[%s1314_s29 + $0x38] sm:$0xff] }
  0x19   : > { %1097 = vmatmul.msk.bf16.vlgmr.msra.gmra.mxu2 %vm602_vm0, %v579_v17  ;;  %v575_v25 = vld [vmem:[%s1327_s15 + $0x28] sm:$0xff]  ;;  %v568_v28 = vpack.c.bf16 %v563_v23, %v562_v22  ;;  %v564_v34 = vld [vmem:[%s1319_s18 + $0x30] sm:$0xff]  ;;  %v565_v35 = vld [vmem:[%s1319_s18 + $0x38] sm:$0xff]  ;;  %v557_v39 = vpack.c.bf16 %v553_v33, %v552_v30 }
  0x1a   : > { %v580_v29 = vpack.c.bf16 %v575_v25, %v574_v24  ;;  %v571_v32 = vld [vmem:[%s1327_s15 + $0x8] sm:$0xff]  ;;  %v576_v36 = vld [vmem:[%s1327_s15 + $0x30] sm:$0xff]  ;;  %v577_v37 = vld [vmem:[%s1327_s15 + $0x38] sm:$0xff]  ;;  %v569_v40 = vpack.c.bf16 %v565_v35, %v564_v34 }
  0x1b   : > { %700 = vmatpush.bf16.msrb.mxu0 %v1104_v4  ;;  %v578_v38 = vpack.c.bf16 %v571_v32, %v570_v31  ;;  %v581_v41 = vpack.c.bf16 %v577_v37, %v576_v36  ;;  %v1390_v50 = vld [vmem:[%s1488_s8] ss:$0 sm:$0xff] }
  0x1f   : > { %776 = vmatpush.bf16.msra.mxu0 %v1107_v2 }
  0x23   : > { %777 = vmatpush.bf16.msra.mxu0 %v1106_v5 }
  0x26   : > { %1084 = vmatmul.msk.bf16.vlgmr.msrb.gmra.mxu0 %vm602_vm0, %v566_v26 }
  0x27   : > { %1074 = vmatmul.msk.bf16.gmra.mxu3 %vm602_vm0, %v556_v27 }
  0x28   : > { %1086 = vmatmul.msk.bf16.gmra.mxu1 %vm602_vm0, %v568_v28 }
  0x29   : > { %1098 = vmatmul.msk.bf16.gmra.mxu2 %vm602_vm0, %v580_v29 }
  0x36   : > { %1096 = vmatmul.msk.bf16.vlgmr.msra.gmra.mxu0 %vm602_vm0, %v578_v38 }
  0x37   : > { %1075 = vmatmul.msk.bf16.gmra.mxu3 %vm602_vm0, %v557_v39 }
  0x38   : > { %1087 = vmatmul.msk.bf16.gmra.mxu1 %vm602_vm0, %v569_v40 }
  0x39   : > { %1099 = vmatmul.msk.bf16.gmra.mxu2 %vm602_vm0, %v581_v41 }
  0x93   : > { %v624_v44 = vpop.f32.mrf.mxu0 }
  0x94   : > { %v625_v45 = vadd.f32 %v1365_v42, %v624_v44 }
  0x95   : > { %v707_v46 = vpop.f32.mrf.mxu1 }
  0x96   : > { %v708_v47 = vadd.f32 %v1370_v43, %v707_v46  ;;  %v644_v48 = vpack.c.bf16 %v625_v45, %v625_v45 }
  0x98   : > { %v724_v49 = vpack.c.bf16 %v708_v47, %v708_v47  ;;  %653 = vst.msk [vmem:[%s1377_s12] sm:$0xf] %vm652_vm1, %v644_v48 }
  0x9a   : > { %732 = vst.msk [vmem:[%s1383_s30 + $0x8] sm:$0xf] %vm652_vm1, %v724_v49  ;;  %v629_v51 = vpop.f32.mrf.mxu3 }
  0x9b   : > { %v630_v52 = vadd.f32 %v1365_v42, %v629_v51  ;;  %v626_v54 = vpop.f32.mrf.mxu0 }
  0x9c   : > { %v784_v53 = vpop.f32.mrf.mxu2  ;;  %v627_v56 = vadd.f32 %v1365_v42, %v626_v54 }
  0x9d   : > { %v785_v55 = vadd.f32 %v1390_v50, %v784_v53  ;;  %v709_v57 = vpop.f32.mrf.mxu1  ;;  %v646_v58 = vpack.c.bf16 %v630_v52, %v630_v52 }
  0x9e   : > { %v710_v59 = vadd.f32 %v1370_v43, %v709_v57  ;;  %v645_v61 = vpack.c.bf16 %v627_v56, %v627_v56 }
  0x9f   : > { %v801_v60 = vpack.c.bf16 %v785_v55, %v785_v55  ;;  %655 = vst.msk [vmem:[%s1377_s12 + $0x8] sm:$0xf] %vm652_vm1, %v646_v58 }
  0xa0   : > { %v725_v62 = vpack.c.bf16 %v710_v59, %v710_v59  ;;  %654 = vst.msk [vmem:[%s1377_s12 + $0x4] sm:$0xf] %vm652_vm1, %v645_v61 }
  0xa1   : > { %809 = vst.msk [vmem:[%s1400_s24 + $0x8] sm:$0xf] %vm652_vm1, %v801_v60 }
  0xa2   : > { %733 = vst.msk [vmem:[%s1383_s30 + $0xc] sm:$0xf] %vm652_vm1, %v725_v62  ;;  %v631_v63 = vpop.f32.mrf.mxu3 }
  0xa3   : > { %v632_v0 = vadd.f32 %v1365_v42, %v631_v63  ;;  %v702_v2 = vpop.f32.mrf.mxu0 }
  0xa4   : > { %v786_v1 = vpop.f32.mrf.mxu2  ;;  %v703_v4 = vadd.f32 %v1370_v43, %v702_v2 }
  0xa5   : > { %v787_v3 = vadd.f32 %v1390_v50, %v786_v1  ;;  %v712_v5 = vpop.f32.mrf.mxu1  ;;  %v647_v6 = vpack.c.bf16 %v632_v0, %v632_v0 }
  0xa6   : > { %v713_v7 = vadd.f32 %v1370_v43, %v712_v5  ;;  %v722_v9 = vpack.c.bf16 %v703_v4, %v703_v4 }
  0xa7   : > { %v802_v8 = vpack.c.bf16 %v787_v3, %v787_v3  ;;  %656 = vst.msk [vmem:[%s1377_s12 + $0xc] sm:$0xf] %vm652_vm1, %v647_v6 }
  0xa8   : > { %v726_v10 = vpack.c.bf16 %v713_v7, %v713_v7  ;;  %730 = vst.msk [vmem:[%s1383_s30] sm:$0xf] %vm652_vm1, %v722_v9 }
  0xa9   : > { %810 = vst.msk [vmem:[%s1400_s24 + $0xc] sm:$0xf] %vm652_vm1, %v802_v8 }
  0xaa   : > { %734 = vst.msk [vmem:[%s1383_s30 + $0x10] sm:$0xf] %vm652_vm1, %v726_v10  ;;  %v634_v11 = vpop.f32.mrf.mxu3 }
  0xab   : > { %v635_v12 = vadd.f32 %v1365_v42, %v634_v11  ;;  %v704_v14 = vpop.f32.mrf.mxu0 }
  0xac   : > { %v789_v13 = vpop.f32.mrf.mxu2  ;;  %v705_v16 = vadd.f32 %v1370_v43, %v704_v14 }
  0xad   : > { %v790_v15 = vadd.f32 %v1390_v50, %v789_v13  ;;  %v714_v17 = vpop.f32.mrf.mxu1  ;;  %v648_v18 = vpack.c.bf16 %v635_v12, %v635_v12 }
  0xae   : > { %v715_v19 = vadd.f32 %v1370_v43, %v714_v17  ;;  %v723_v21 = vpack.c.bf16 %v705_v16, %v705_v16 }
  0xaf   : > { %v803_v20 = vpack.c.bf16 %v790_v15, %v790_v15  ;;  %657 = vst.msk [vmem:[%s1377_s12 + $0x10] sm:$0xf] %vm652_vm1, %v648_v18 }
  0xb0   : > { %v727_v22 = vpack.c.bf16 %v715_v19, %v715_v19  ;;  %731 = vst.msk [vmem:[%s1383_s30 + $0x4] sm:$0xf] %vm652_vm1, %v723_v21 }
  0xb1   : > { %811 = vst.msk [vmem:[%s1400_s24 + $0x10] sm:$0xf] %vm652_vm1, %v803_v20 }
  0xb2   : > { %735 = vst.msk [vmem:[%s1383_s30 + $0x14] sm:$0xf] %vm652_vm1, %v727_v22  ;;  %v636_v23 = vpop.f32.mrf.mxu3 }
  0xb3   : > { %v637_v24 = vadd.f32 %v1365_v42, %v636_v23  ;;  %v779_v26 = vpop.f32.mrf.mxu0 }
  0xb4   : > { %v791_v25 = vpop.f32.mrf.mxu2  ;;  %v780_v29 = vadd.f32 %v1390_v50, %v779_v26 }
  0xb5   : > { %v792_v27 = vadd.f32 %v1390_v50, %v791_v25  ;;  %v717_v28 = vpop.f32.mrf.mxu1  ;;  %v649_v30 = vpack.c.bf16 %v637_v24, %v637_v24 }
  0xb6   : > { %v718_v31 = vadd.f32 %v1370_v43, %v717_v28  ;;  %v799_v33 = vpack.c.bf16 %v780_v29, %v780_v29 }
  0xb7   : > { %v804_v32 = vpack.c.bf16 %v792_v27, %v792_v27  ;;  %658 = vst.msk [vmem:[%s1377_s12 + $0x14] sm:$0xf] %vm652_vm1, %v649_v30 }
  0xb8   : > { %v728_v34 = vpack.c.bf16 %v718_v31, %v718_v31  ;;  %807 = vst.msk [vmem:[%s1400_s24] sm:$0xf] %vm652_vm1, %v799_v33 }
  0xb9   : > { %812 = vst.msk [vmem:[%s1400_s24 + $0x14] sm:$0xf] %vm652_vm1, %v804_v32 }
  0xba   : > { %736 = vst.msk [vmem:[%s1383_s30 + $0x18] sm:$0xf] %vm652_vm1, %v728_v34  ;;  %v639_v35 = vpop.f32.mrf.mxu3 }
  0xbb   : > { %v640_v36 = vadd.f32 %v1365_v42, %v639_v35  ;;  %v781_v38 = vpop.f32.mrf.mxu0 }
  0xbc   : > { %v794_v37 = vpop.f32.mrf.mxu2  ;;  %v782_v41 = vadd.f32 %v1390_v50, %v781_v38 }
  0xbd   : > { %v795_v39 = vadd.f32 %v1390_v50, %v794_v37  ;;  %v719_v40 = vpop.f32.mrf.mxu1  ;;  %v650_v44 = vpack.c.bf16 %v640_v36, %v640_v36 }
  0xbe   : > { %v720_v45 = vadd.f32 %v1370_v43, %v719_v40  ;;  %v800_v47 = vpack.c.bf16 %v782_v41, %v782_v41 }
  0xbf   : > { %v805_v46 = vpack.c.bf16 %v795_v39, %v795_v39  ;;  %659 = vst.msk [vmem:[%s1377_s12 + $0x18] sm:$0xf] %vm652_vm1, %v650_v44 }
  0xc0   : > { %v729_v48 = vpack.c.bf16 %v720_v45, %v720_v45  ;;  %808 = vst.msk [vmem:[%s1400_s24 + $0x4] sm:$0xf] %vm652_vm1, %v800_v47 }
  0xc1   : > { %813 = vst.msk [vmem:[%s1400_s24 + $0x18] sm:$0xf] %vm652_vm1, %v805_v46 }
  0xc2   : > { %737 = vst.msk [vmem:[%s1383_s30 + $0x1c] sm:$0xf] %vm652_vm1, %v729_v48  ;;  %v641_v49 = vpop.f32.mrf.mxu3 }
  0xc3   : > { %v642_v51 = vadd.f32 %v1365_v42, %v641_v49 }
  0xc4   : > { %v796_v52 = vpop.f32.mrf.mxu2 }
  0xc5   : > { %v797_v53 = vadd.f32 %v1390_v50, %v796_v52  ;;  %v651_v54 = vpack.c.bf16 %v642_v51, %v642_v51 }
  0xc7   : > { %v806_v55 = vpack.c.bf16 %v797_v53, %v797_v53  ;;  %660 = vst.msk [vmem:[%s1377_s12 + $0x1c] sm:$0xf] %vm652_vm1, %v651_v54 }
  0xc9   : > { %814 = vst.msk [vmem:[%s1400_s24 + $0x1c] sm:$0xf] %vm652_vm1, %v806_v55 }
  0xca PF: > { %s22_s21 = sadd.s32 1, %s1195_s21   ;;  %s1492_s17 = smov %s1187_s19 }
  0xcb   : > { %p19_p7 = scmp.ge.s32.totalorder %s22_s21, 10   ;;  %s1493_s18 = smov %s1191_s20 }
  0xcc   : > { %s1494_s19 = smov %s1497_s22  ;;  %s1495_s20 = smov %s1501_s23 }
  0xcd   :  { %21 = sbr.rel (!%p19_p7) target bundleno = 3 (0x3), region = 116 }

</bundles_post_ra>
